<compile_context>
chip_gen: v5e
topology: v5e:2x2
jax: 0.10.0
libtpu: 0.0.40
codegen_flags: <defaults>
</compile_context>

<pallas_src>
import jax
import jax.numpy as jnp
from jax.experimental import pallas as pl
from jax.experimental.pallas import tpu as pltpu


# ---------------------------------------------------------------------------
# Shared in-kernel step math (all gate math in f32, dot operands in w.dtype).
# ---------------------------------------------------------------------------
def _lstm_step_math(tok, h_prev, c_prev, w, b):
    # tok: (B, F) f32; h_prev/c_prev: (B, H) f32; w: (H+F, 4H) bf16; b: (1, 4H) f32
    H = h_prev.shape[1]
    # [h_prev | token]: h_prev fills whole vregs (H multiple of 128 in the demo),
    # token lands at lane 0 of the next vreg column -> aligned concat.
    xh = jnp.concatenate([h_prev, tok], axis=1).astype(w.dtype)
    gates = jnp.dot(xh, w, preferred_element_type=jnp.float32) + b   # (B, 4H) f32

    i = jax.nn.sigmoid(gates[:, 0 * H:1 * H])
    f = jax.nn.sigmoid(gates[:, 1 * H:2 * H])
    g = jnp.tanh(gates[:, 2 * H:3 * H])
    o = jax.nn.sigmoid(gates[:, 3 * H:4 * H])

    c_new = f * c_prev + i * g
    h_new = o * jnp.tanh(c_new)
    return h_new, c_new


# ---------------------------------------------------------------------------
# Kernels
# ---------------------------------------------------------------------------
def lstm_step_kernel(tok_ref, prev_ref, w_ref, b_ref, out_ref):
    # Single LSTMCell step; module-exact semantics.
    H = prev_ref.shape[1] // 2
    h_prev = prev_ref[:, :H].astype(jnp.float32)
    c_prev = prev_ref[:, H:].astype(jnp.float32)
    h_new, c_new = _lstm_step_math(
        tok_ref[...].astype(jnp.float32), h_prev, c_prev, w_ref[...], b_ref[...])
    out_ref[...] = jnp.concatenate([h_new, c_new], axis=1).astype(out_ref.dtype)


def lstm_seq_kernel(tok_ref, prev_ref, w_ref, b_ref, out_ref, state_ref):
    # Decode loop hoisted into the kernel: grid axis 0 is time ("arbitrary").
    # Weights / bias / initial state are resident (constant index maps); the packed
    # (h, c) state is carried across grid steps in f32 VMEM scratch.
    t = pl.program_id(0)

    @pl.when(t == 0)
    def _():
        state_ref[...] = prev_ref[...].astype(jnp.float32)

    H = state_ref.shape[1] // 2
    h_prev = state_ref[:, :H]
    c_prev = state_ref[:, H:]
    h_new, c_new = _lstm_step_math(
        tok_ref[0].astype(jnp.float32), h_prev, c_prev, w_ref[...], b_ref[...])

    packed = jnp.concatenate([h_new, c_new], axis=1)
    state_ref[...] = packed
    out_ref[...] = packed.astype(out_ref.dtype)   # resident block; written back once


# ---------------------------------------------------------------------------
# One-time (init-time) parameter prep: fold the concat / bias add / bf16 cast.
# ---------------------------------------------------------------------------
def prepare_lstm_params(weight_ih, weight_hh, bias_ih, bias_hh,
                        compute_dtype=jnp.bfloat16):
    """weight_ih: (4H, F), weight_hh: (4H, H), biases: (4H,)  [PyTorch layout].

    Returns W_cat: (H+F, 4H) in compute_dtype (rows = [W_hh.T ; W_ih.T], matching
    the in-kernel xh = [h_prev | token] ordering) and b_cat: (1, 4H) f32.
    """
    w_cat = jnp.concatenate([weight_hh.T, weight_ih.T], axis=0).astype(compute_dtype)
    b_cat = (bias_ih + bias_hh).reshape(1, -1).astype(jnp.float32)
    return w_cat, b_cat


# ---------------------------------------------------------------------------
# Wrappers
# ---------------------------------------------------------------------------
def lstm_summary_decoder(token, previous, w_cat, b_cat):
    """Single step. token: (B, F); previous: (B, 2H); returns (packed, packed)."""
    B, F = token.shape
    NH = previous.shape[1]
    assert NH % 2 == 0
    H = NH // 2
    K = H + F
    assert w_cat.shape == (K, 4 * H) and b_cat.shape == (1, 4 * H)

    out = pl.pallas_call(
        lstm_step_kernel,
        out_shape=jax.ShapeDtypeStruct((B, NH), previous.dtype),
        grid=(1,),
        in_specs=[
            pl.BlockSpec((B, F), lambda i: (0, 0)),
            pl.BlockSpec((B, NH), lambda i: (0, 0)),
            pl.BlockSpec((K, 4 * H), lambda i: (0, 0)),
            pl.BlockSpec((1, 4 * H), lambda i: (0, 0)),
        ],
        out_specs=pl.BlockSpec((B, NH), lambda i: (0, 0)),
        # State overwrite: previous and the packed output share a buffer.
        input_output_aliases={1: 0},
        compiler_params=pltpu.CompilerParams(dimension_semantics=("arbitrary",)),
    )(token, previous, w_cat, b_cat)
    return out, out


def lstm_summary_decoder_sequence(tokens, previous, w_cat, b_cat):
    """Runs T steps inside ONE kernel. tokens: (T, B, F); previous: (B, 2H).

    Returns the final packed (h, c) state twice (same contract as T chained
    module calls, keeping only the last output).
    """
    T, B, F = tokens.shape
    NH = previous.shape[1]
    assert NH % 2 == 0
    H = NH // 2
    K = H + F
    assert w_cat.shape == (K, 4 * H) and b_cat.shape == (1, 4 * H)

    out = pl.pallas_call(
        lstm_seq_kernel,
        out_shape=jax.ShapeDtypeStruct((B, NH), previous.dtype),
        grid=(T,),
        in_specs=[
            pl.BlockSpec((1, B, F), lambda t: (t, 0, 0)),     # per-step token tile
            pl.BlockSpec((B, NH), lambda t: (0, 0)),          # resident initial state
            pl.BlockSpec((K, 4 * H), lambda t: (0, 0)),       # resident weights
            pl.BlockSpec((1, 4 * H), lambda t: (0, 0)),       # resident bias
        ],
        out_specs=pl.BlockSpec((B, NH), lambda t: (0, 0)),
        scratch_shapes=[pltpu.VMEM((B, NH), jnp.float32)],    # carried (h, c) state
        compiler_params=pltpu.CompilerParams(dimension_semantics=("arbitrary",)),
    )(tokens, previous, w_cat, b_cat)
    return out, out


# ---------------------------------------------------------------------------
# Synthetic init + pure-JAX reference
# ---------------------------------------------------------------------------
def init_lstm_cell_params(key, num_features, hidden, dtype=jnp.float32):
    # TODO(synk): original module calls a custom init_lstm_weights(); exact init not
    # in spec — uses nn.LSTMCell's default U(-1/sqrt(H), 1/sqrt(H)).
    k1, k2, k3, k4 = jax.random.split(key, 4)
    bound = 1.0 / (hidden ** 0.5)
    weight_ih = jax.random.uniform(k1, (4 * hidden, num_features), dtype, -bound, bound)
    weight_hh = jax.random.uniform(k2, (4 * hidden, hidden), dtype, -bound, bound)
    bias_ih = jax.random.uniform(k3, (4 * hidden,), dtype, -bound, bound)
    bias_hh = jax.random.uniform(k4, (4 * hidden,), dtype, -bound, bound)
    return weight_ih, weight_hh, bias_ih, bias_hh


def lstm_summary_decoder_ref(token, previous, weight_ih, weight_hh, bias_ih, bias_hh):
    """Pure-JAX f32 reference matching torch.nn.LSTMCell semantics."""
    H = previous.shape[1] // 2
    h, c = previous[:, :H], previous[:, H:]
    gates = token @ weight_ih.T + h @ weight_hh.T + bias_ih + bias_hh
    i, f, g, o = jnp.split(gates, 4, axis=1)
    i, f, o = jax.nn.sigmoid(i), jax.nn.sigmoid(f), jax.nn.sigmoid(o)
    g = jnp.tanh(g)
    c_new = f * c + i * g
    h_new = o * jnp.tanh(c_new)
    return jnp.concatenate([h_new, c_new], axis=1)


if __name__ == "__main__":
    key = jax.random.PRNGKey(0)
    k_tok, k_seq, k_prev, k_par = jax.random.split(key, 4)

    B = 8                  # batch
    num_features = 32      # F
    num_hidden = 256       # 2H; H = 128 -> every slice/concat is 128-lane aligned
    H = num_hidden // 2
    T = 8                  # decode steps for the in-kernel-loop variant

    token = jax.random.normal(k_tok, (B, num_features), jnp.float32)
    tokens = jax.random.normal(k_seq, (T, B, num_features), jnp.float32)
    previous = jax.random.normal(k_prev, (B, num_hidden), jnp.float32)

    weight_ih, weight_hh, bias_ih, bias_hh = init_lstm_cell_params(
        k_par, num_features, H)
    w_cat, b_cat = prepare_lstm_params(weight_ih, weight_hh, bias_ih, bias_hh)

    # f32 references BEFORE the kernel calls (the single-step call donates `previous`).
    y_ref = lstm_summary_decoder_ref(
        token, previous, weight_ih, weight_hh, bias_ih, bias_hh)
    s_ref = previous
    for t in range(T):
        s_ref = lstm_summary_decoder_ref(
            tokens[t], s_ref, weight_ih, weight_hh, bias_ih, bias_hh)

    # Sequence variant first (reads `previous`, no aliasing).
    y_seq, _ = lstm_summary_decoder_sequence(tokens, previous, w_cat, b_cat)
    y_seq = jax.block_until_ready(y_seq)

    # Single-step (module-exact) variant; aliases `previous` -> output.
    y0, y1 = lstm_summary_decoder(token, previous, w_cat, b_cat)
    y0 = jax.block_until_ready(y0)
    y1 = jax.block_until_ready(y1)

    assert y0.shape == (B, num_hidden) and y1.shape == (B, num_hidden)
    assert y_seq.shape == (B, num_hidden)
    # Tolerances account for bf16 MXU operands (gate math stays f32).
    assert jnp.allclose(y0, y_ref, atol=2e-2, rtol=2e-2)
    assert jnp.allclose(y1, y_ref, atol=2e-2, rtol=2e-2)
    assert jnp.allclose(y_seq, s_ref, atol=5e-2, rtol=5e-2)

    print("KERNEL_OK")
</pallas_src>

<mosaic_0001>
module attributes {stable_mosaic.version = 11 : i64} {
  func.func @lstm_seq_kernel(%arg0: i32, %arg1: memref<1x8x32xf32, #tpu.memory_space<vmem>>, %arg2: memref<8x256xf32, #tpu.memory_space<vmem>>, %arg3: memref<160x512xbf16, #tpu.memory_space<vmem>>, %arg4: memref<1x512xf32, #tpu.memory_space<vmem>>, %arg5: memref<8x256xf32, #tpu.memory_space<vmem>>, %arg6: memref<8x256xf32, #tpu.memory_space<vmem>>) attributes {dimension_semantics = [#tpu.dimension_semantics<arbitrary>], iteration_bounds = array<i64: 8>, scalar_prefetch = 0 : i64, scratch_operands = 1 : i64, tpu.core_type = #tpu.core_type<tc>, window_params = [{transform_indices = @transform_0, window_bounds = array<i64: 1, 8, 32>}, {pipeline_mode = #tpu.pipeline_mode<synchronous>, transform_indices = @transform_1, window_bounds = array<i64: 8, 256>}, {pipeline_mode = #tpu.pipeline_mode<synchronous>, transform_indices = @transform_2, window_bounds = array<i64: 160, 512>}, {pipeline_mode = #tpu.pipeline_mode<synchronous>, transform_indices = @transform_3, window_bounds = array<i64: 1, 512>}, {pipeline_mode = #tpu.pipeline_mode<synchronous>, transform_indices = @transform_4, window_bounds = array<i64: 8, 256>}]} {
    %c0_i32 = arith.constant 0 : i32
    %0 = arith.cmpi eq, %arg0, %c0_i32 : i32
    %1 = arith.extui %0 : i1 to i32
    %c0_i32_0 = arith.constant 0 : i32
    %2 = arith.cmpi ne, %1, %c0_i32_0 : i32
    scf.if %2 {
      %c0_17 = arith.constant 0 : index
      %c0_18 = arith.constant 0 : index
      %42 = vector.load %arg2[%c0_17, %c0_18] : memref<8x256xf32, #tpu.memory_space<vmem>>, vector<8x256xf32>
      %c0_19 = arith.constant 0 : index
      %c0_20 = arith.constant 0 : index
      %43 = vector.load %arg6[%c0_19, %c0_20] : memref<8x256xf32, #tpu.memory_space<vmem>>, vector<8x256xf32>
      tpu.vector_store %arg6[%c0_19, %c0_20], %42 {strides = array<i32>} : memref<8x256xf32, #tpu.memory_space<vmem>>, vector<8x256xf32>,
    } else {
    }
    %c0 = arith.constant 0 : index
    %c0_1 = arith.constant 0 : index
    %3 = vector.load %arg6[%c0, %c0_1] : memref<8x256xf32, #tpu.memory_space<vmem>>, vector<8x128xf32>
    %c0_2 = arith.constant 0 : index
    %c128 = arith.constant 128 : index
    %4 = vector.load %arg6[%c0_2, %c128] : memref<8x256xf32, #tpu.memory_space<vmem>>, vector<8x128xf32>
    %c0_3 = arith.constant 0 : index
    %c0_4 = arith.constant 0 : index
    %c0_5 = arith.constant 0 : index
    %5 = vector.load %arg1[%c0_3, %c0_4, %c0_5] : memref<1x8x32xf32, #tpu.memory_space<vmem>>, vector<1x8x32xf32>
    %6 = vector.shape_cast %5 : vector<1x8x32xf32> to vector<8x32xf32>
    %c0_6 = arith.constant 0 : index
    %c0_7 = arith.constant 0 : index
    %7 = vector.load %arg3[%c0_6, %c0_7] : memref<160x512xbf16, #tpu.memory_space<vmem>>, vector<160x512xbf16>
    %c0_8 = arith.constant 0 : index
    %c0_9 = arith.constant 0 : index
    %8 = vector.load %arg4[%c0_8, %c0_9] : memref<1x512xf32, #tpu.memory_space<vmem>>, vector<1x512xf32>
    %9 = tpu.concatenate %3, %6 in 1 : vector<8x128xf32>, vector<8x32xf32> -> vector<8x160xf32>
    %10 = arith.truncf %9 : vector<8x160xf32> to vector<8x160xbf16>
    %cst = arith.constant dense<0.000000e+00> : vector<8x512xf32>
    %11 = tpu.matmul %10, %7, %cst {dimension_numbers = #tpu.dot_dimension_numbers<[1], [0], [0], [1], [0, 0, 1, 1], [], []>} : vector<8x160xbf16>, vector<160x512xbf16>, vector<8x512xf32> -> vector<8x512xf32>
    %12 = vector.broadcast %8 : vector<1x512xf32> to vector<8x512xf32>
    %13 = arith.addf %11, %12 : vector<8x512xf32>
    %14 = vector.extract_strided_slice %13 {offsets = [0, 0], sizes = [8, 128], strides = [1, 1]} : vector<8x512xf32> to vector<8x128xf32>
    %15 = arith.negf %14 : vector<8x128xf32>
    %16 = math.exp %15 : vector<8x128xf32>
    %cst_10 = arith.constant 1.000000e+00 : f32
    %17 = vector.broadcast %cst_10 : f32 to vector<8x128xf32>
    %18 = arith.addf %17, %16 : vector<8x128xf32>
    %19 = arith.divf %17, %18 : vector<8x128xf32>
    %20 = vector.extract_strided_slice %13 {offsets = [0, 128], sizes = [8, 128], strides = [1, 1]} : vector<8x512xf32> to vector<8x128xf32>
    %21 = arith.negf %20 : vector<8x128xf32>
    %22 = math.exp %21 : vector<8x128xf32>
    %cst_11 = arith.constant 1.000000e+00 : f32
    %23 = vector.broadcast %cst_11 : f32 to vector<8x128xf32>
    %24 = arith.addf %23, %22 : vector<8x128xf32>
    %25 = arith.divf %23, %24 : vector<8x128xf32>
    %26 = vector.extract_strided_slice %13 {offsets = [0, 256], sizes = [8, 128], strides = [1, 1]} : vector<8x512xf32> to vector<8x128xf32>
    %27 = math.tanh %26 : vector<8x128xf32>
    %28 = vector.extract_strided_slice %13 {offsets = [0, 384], sizes = [8, 128], strides = [1, 1]} : vector<8x512xf32> to vector<8x128xf32>
    %29 = arith.negf %28 : vector<8x128xf32>
    %30 = math.exp %29 : vector<8x128xf32>
    %cst_12 = arith.constant 1.000000e+00 : f32
    %31 = vector.broadcast %cst_12 : f32 to vector<8x128xf32>
    %32 = arith.addf %31, %30 : vector<8x128xf32>
    %33 = arith.divf %31, %32 : vector<8x128xf32>
    %34 = arith.mulf %25, %4 : vector<8x128xf32>
    %35 = arith.mulf %19, %27 : vector<8x128xf32>
    %36 = arith.addf %34, %35 : vector<8x128xf32>
    %37 = math.tanh %36 : vector<8x128xf32>
    %38 = arith.mulf %33, %37 : vector<8x128xf32>
    %39 = tpu.concatenate %38, %36 in 1 : vector<8x128xf32>, vector<8x128xf32> -> vector<8x256xf32>
    %c0_13 = arith.constant 0 : index
    %c0_14 = arith.constant 0 : index
    %40 = vector.load %arg6[%c0_13, %c0_14] : memref<8x256xf32, #tpu.memory_space<vmem>>, vector<8x256xf32>
    tpu.vector_store %arg6[%c0_13, %c0_14], %39 {strides = array<i32>} : memref<8x256xf32, #tpu.memory_space<vmem>>, vector<8x256xf32>,
    %c0_15 = arith.constant 0 : index
    %c0_16 = arith.constant 0 : index
    %41 = vector.load %arg5[%c0_15, %c0_16] : memref<8x256xf32, #tpu.memory_space<vmem>>, vector<8x256xf32>
    tpu.vector_store %arg5[%c0_15, %c0_16], %39 {strides = array<i32>} : memref<8x256xf32, #tpu.memory_space<vmem>>, vector<8x256xf32>,
    return
  }
  func.func @transform_0(%arg0: i32) -> (i32, i32, i32) {
    %c0_i32 = arith.constant 0 : i32
    %c0_i32_0 = arith.constant 0 : i32
    %c0_i32_1 = arith.constant 0 : i32
    return %arg0, %c0_i32, %c0_i32_0 : i32, i32, i32
  }
  func.func @transform_1(%arg0: i32) -> (i32, i32) {
    %c0_i32 = arith.constant 0 : i32
    %c0_i32_0 = arith.constant 0 : i32
    %c0_i32_1 = arith.constant 0 : i32
    return %c0_i32, %c0_i32_0 : i32, i32
  }
  func.func @transform_2(%arg0: i32) -> (i32, i32) {
    %c0_i32 = arith.constant 0 : i32
    %c0_i32_0 = arith.constant 0 : i32
    %c0_i32_1 = arith.constant 0 : i32
    return %c0_i32, %c0_i32_0 : i32, i32
  }
  func.func @transform_3(%arg0: i32) -> (i32, i32) {
    %c0_i32 = arith.constant 0 : i32
    %c0_i32_0 = arith.constant 0 : i32
    %c0_i32_1 = arith.constant 0 : i32
    return %c0_i32, %c0_i32_0 : i32, i32
  }
  func.func @transform_4(%arg0: i32) -> (i32, i32) {
    %c0_i32 = arith.constant 0 : i32
    %c0_i32_0 = arith.constant 0 : i32
    %c0_i32_1 = arith.constant 0 : i32
    return %c0_i32, %c0_i32_0 : i32, i32
  }
}

</mosaic_0001>

<bundles_post_ra>
// kernel: tpu_custom_call.1
= control target key start
LH: loop header
LB: loop body
LE: loop exit
PB: predicated region body
PF: predicated region fallthrough
CT: control target
= control target key end

     0   :  { %9 = vsyncpa [#allocation4], 0  ;;  %s1463_s0 = inlined_call_operand.hbm [shape: f32[8,8,32], index: 0, kind: input, shape index: {}]   ;;  %s1464_s1 = inlined_call_operand.hbm [shape: f32[8,256], index: 1, kind: input, shape index: {}]   ;;  %s1465_s2 = inlined_call_operand.hbm [shape: bf16[160,512], index: 2, kind: input, shape index: {}]   ;;  %s1466_s3 = inlined_call_operand.hbm [shape: f32[1,512], index: 3, kind: input, shape index: {}]   ;;  %s1467_s4 = inlined_call_operand.hbm [shape: f32[8,256], index: 4, kind: output, shape index: {}]  }
   0x1   :  { %11 = vsyncpa [#allocation4 + $0x1], 0 }
   0x2   :  { %12 = vsyncpa [#allocation7], 0 }
   0x3   :  { %13 = vsyncpa [#allocation10], 0 }
   0x4   :  { %14 = vsyncpa [#allocation5], 0  ;;  %s1323_s15 = smov 0   ;;  %s1325_s16 = smov 0  }
   0x5   :  { %s1327_s17 = smov 0   ;;  %s1329_s18 = smov 0  }
   0x6 LB: > { %s1342_s19 = sadd.s32 4294967295, %s1290_s18   ;;  %p40_p0 = scmp.ne.s32.totalorder %s1282_s16, %s1278_s15  ;;  %s1290_s18 = sphi %s1329_s18, %s1475_s18   ;;  %s1286_s17 = sphi %s1327_s17, %s1474_s17   ;;  %s1282_s16 = sphi %s1325_s16, %s1473_s16   ;;  %s1278_s15 = sphi %s1323_s15, %s1472_s15  }
   0x7   : > { %p41_p1 = scmp.eq.s32.totalorder %s1342_s19, 0  ;;  %p777_p2 = scmp.ge.s32.totalorder %s1290_s18, 1 }
   0x8   : > { %p135_p3 = scmp.lt.s32.totalorder %s1290_s18, 9  ;;  %p778_p4 = scmp.ne.s32.totalorder %s1342_s19, 0 }
   0x9   : > { %p1351_p5 = por %p41_p1, %p40_p0  ;;  %s147_s23 = sshll.u32 %s1464_s1, 4  ;;  %s148_s23 = int_to_ptr.hbm [resolvable:$true] %s147_s23 }
   0xa   : > { %p1358_p6 = pnand %p777_p2, %p135_p3  ;;  %s1292_s25 = smov [#allocation6]  }
   0xb   : > { %s149_s26 = sshll.u32 %s1292_s25, 4  ;;  %s158_s29 = sshll.u32 %s1465_s2, 4  ;;  %s150_s26 = int_to_ptr.vmem [resolvable:$true] %s149_s26  ;;  %s159_s29 = int_to_ptr.hbm [resolvable:$true] %s158_s29 }
   0xc   : > { %p1019_p7 = pneg %p1358_p6  ;;  %s1293_s5 = smov [#allocation8]  }
   0xd   : > { %s160_s6 = sshll.u32 %s1293_s5, 4  ;;  %s1294_s7 = smov 256   ;;  %s161_s6 = int_to_ptr.vmem [resolvable:$true] %s160_s6 }
   0xe   : > { %p1369_p8 = pnand %p1019_p7, %p41_p1  ;;  %s1295_s8 = smov 16  }
   0xf   : > { %s173_s11 = sshll.u32 %s1466_s3, 4  ;;  %s1296_s12 = smov [#allocation9]   ;;  %s174_s11 = int_to_ptr.hbm [resolvable:$true] %s173_s11 }
  0x10   : > { %1022 = dma.hbm_to_vmem [thread:$0]  (!%p1369_p8), %s148_s23, 256, %s150_s26, [#allocation7]  }
  0x11   : > { %1025 = dma.hbm_to_vmem [thread:$0]  (!%p1369_p8), %s159_s29, 5120, %s161_s6, [#allocation7], %s1294_s7, %s1294_s7, %s1295_s8  }
  0x12   : > { %s175_s13 = sshll.u32 %s1296_s12, 4  ;;  %s1383_s14 = sadd.s32 1, %s1290_s18   ;;  %s176_s13 = int_to_ptr.vmem [resolvable:$true] %s175_s13 }
  0x13   : > { %1028 = dma.hbm_to_vmem [thread:$0]  (!%p1369_p8), %s174_s11, 64, %s176_s13, [#allocation10]  }
  0x14   : > { %s24_s15 = ssub.s32 %s1290_s18, %s1383_s14  ;;  %s27_s21 = sadd.s32 1, %s1286_s17 }
  0x15   : > { %p25_p9 = scmp.eq.s32.totalorder %s24_s15, 0  ;;  %p34_p10 = scmp.ne.s32.totalorder %s1286_s17, %s1282_s16 }
  0x16   : > { %p35_p11 = scmp.eq.s32.totalorder %s1290_s18, 0  ;;  %p1036_p12 = scmp.lt.s32.totalorder %s1290_s18, 8 }
  0x17   : > { %s1393_s22 = scalar_select %p25_p9, %s1286_s17, %s27_s21  }
  0x18   : > { %p36_p13 = por %p35_p11, %p34_p10  ;;  %s186_s23 = sand.u32 1, %s1286_s17  }
  0x19   : > { %s782_s25 = sshll.u32 %s186_s23, 3  ;;  %s783_s26 = sshll.u32 %s1290_s18, 3 }
  0x1a   : > { %s194_s29 = scalar_lea.hbm %s1463_s0, %s783_s26  ;;  %s190_s30 = scalar_lea.vmem [#allocation3], %s782_s25 }
  0x1b   : > { %s198_s5 = sshll.u32 %s190_s30, 4  ;;  %s196_s6 = sshll.u32 %s194_s29, 4  ;;  %s199_s5 = int_to_ptr.vmem [resolvable:$true] %s198_s5  ;;  %s197_s6 = int_to_ptr.hbm [resolvable:$true] %s196_s6 }
  0x1c   : > { %p1400_p0 = pnand %p1036_p12, %p36_p13  ;;  %s187_s8 = scalar_lea.sflag [#allocation4], %s186_s23 }
  0x1d   : > { %s1186_s9 = sshra.s32 %s197_s6, 4  ;;  %s1193_s12 = scalar_lea.hbm %s1463_s0, 64  ;;  %s1187_s9 = int_to_ptr.hbm [resolvable:$true] %s1186_s9 }
  0x1e   : > { %s1188_s10 = scalar_lea.hbm %s1187_s9, 8  ;;  %p1190_p3 = pneg %p1400_p0 }
  0x1f   : > { %p1189_p2 = scmp.ne.s32.totalorder %s1187_s9, %s1188_s10  ;;  %p1194_p9 = scmp.lt.s32.totalorder %s1187_s9, %s1463_s0 }
  0x20   : > { %p1195_p10 = scmp.lt.s32.totalorder %s1193_s12, %s1188_s10 }
  0x21   : > { %p1191_p7 = pnand %p1190_p3, %p1189_p2 }
  0x22   : > { %p1196_p11 = por %p1195_p10, %p1194_p9 }
  0x23   : > { %p1192_p8 = pneg %p1191_p7 }
  0x25   : > { %p1197_p12 = pnand %p1196_p11, %p1192_p8 }
  0x27   : > { %1200 = shalt.err (!%p1197_p12)
}
  0x28   : > { %1032 = dma.hbm_to_vmem [thread:$0]  (!%p1400_p0), %s197_s6, 128, %s199_s5, %s187_s8  }
  0x29   : > { %207 = sbr.rel (%p1358_p6) target bundleno = 290 (0x122), region = 36  ;;  %s209_s21 = sand.u32 (!%p1358_p6), 1, %s1282_s16  }
  0x2a   : > { %s1417_s23 = sshll.u32 (!%p1358_p6), %s209_s21, 3  ;;  %s210_s25 = scalar_lea.sflag (!%p1358_p6), [#allocation4], %s209_s21 }
  0x2b   : > { %s213_s26 = scalar_lea.vmem (!%p1358_p6), [#allocation3], %s1417_s23 }
  0x2e   : > { %1261 = dma.done.wait (%p1351_p5), %s210_s25, 128  }
  0x2f   : > { %1263 = vsyncadd (%p1351_p5), %s210_s25, 4294967168 }
  0x30   : > { %1265 = dma.done.wait (%p41_p1), [#allocation7], 5376  }
  0x31   : > { %1267 = vsyncadd (%p41_p1), [#allocation7], 4294961920 }
  0x32   : > { %1269 = dma.done.wait (%p41_p1), [#allocation10], 64  }
  0x33   : > { %1271 = vsyncadd (%p41_p1), [#allocation10], 4294967232  ;;  %253 = sbr.rel (%p778_p4) target bundleno = 59 (0x3b), region = 56 }
  0x38   : > { %v254_v0 = vld [vmem:[#allocation6] sm:$0xff]  ;;  %v255_v1 = vld [vmem:[#allocation6 + $0x8] sm:$0xff] }
  0x39   : > { %256 = vst [vmem:[#allocation2] sm:$0xff] %v254_v0 }
  0x3a   : > { %257 = vst [vmem:[#allocation2 + $0x8] sm:$0xff] %v255_v1 }
  0x3b PF: > { %v904_v2 = vld [vmem:[#allocation8 + $0xe0] sm:$0xf]  ;;  %v991_v3 = vld [vmem:[#allocation8 + $0xec] sm:$0xf0]  ;;  %v989_v4 = vld [vmem:[#allocation8 + $0xe4] sm:$0xf] }
  0x3c   : > { %v905_v5 = vor.u32 %v991_v3, %v904_v2  ;;  %v906_v6 = vld [vmem:[#allocation8 + $0xf0] sm:$0xf0]  ;;  %v888_v7 = vld [vmem:[#allocation8 + $0xc0] sm:$0xf]  ;;  %v987_v8 = vld [vmem:[#allocation8 + $0xcc] sm:$0xf0] }
  0x3d   : > { %v909_v9 = vor.u32 %v989_v4, %v906_v6  ;;  %v985_v10 = vld [vmem:[#allocation8 + $0xc4] sm:$0xf]  ;;  %v890_v11 = vld [vmem:[#allocation8 + $0xd0] sm:$0xf0]  ;;  %v944_v12 = vld [vmem:[#allocation8 + $0x128] sm:$0xf]  ;;  %v889_v13 = vor.u32 %v987_v8, %v888_v7 }
  0x3e   : > { %517 = vmatpush.bf16.msra.mxu0 %v905_v5  ;;  %v1000_v14 = vld [vmem:[#allocation8 + $0x134] sm:$0xf0]  ;;  %v872_v15 = vld [vmem:[#allocation8 + $0xa0] sm:$0xf]  ;;  %v983_v16 = vld [vmem:[#allocation8 + $0xac] sm:$0xf0]  ;;  %v893_v17 = vor.u32 %v985_v10, %v890_v11 }
  0x3f   : > { %543 = vmatpush.bf16.msra.mxu2 %v909_v9  ;;  %v945_v18 = vor.u32 %v1000_v14, %v944_v12  ;;  %v936_v19 = vld [vmem:[#allocation8 + $0x120] sm:$0xf]  ;;  %v999_v20 = vld [vmem:[#allocation8 + $0x12c] sm:$0xf0]  ;;  %v981_v21 = vld [vmem:[#allocation8 + $0xa4] sm:$0xf]  ;;  %v873_v28 = vor.u32 %v983_v16, %v872_v15 }
  0x40   : > { %v937_v22 = vor.u32 %v999_v20, %v936_v19  ;;  %v874_v23 = vld [vmem:[#allocation8 + $0xb0] sm:$0xf0]  ;;  %v928_v24 = vld [vmem:[#allocation8 + $0x108] sm:$0xf]  ;;  %v996_v25 = vld [vmem:[#allocation8 + $0x114] sm:$0xf0] }
  0x41   : > { %588 = vmatpush.bf16.msra.mxu3 %v945_v18  ;;  %v929_v26 = vor.u32 %v996_v25, %v928_v24  ;;  %v920_v27 = vld [vmem:[#allocation8 + $0x100] sm:$0xf]  ;;  %v979_v30 = vld [vmem:[#allocation8 + $0x8c] sm:$0xf0]  ;;  %v877_v32 = vor.u32 %v981_v21, %v874_v23  ;;  %v990_v34 = vld [vmem:[#allocation8 + $0xec] sm:$0xf] }
  0x42   : > { %518 = vmatpush.bf16.msra.mxu0 %v889_v13  ;;  %536 = vmatpush.bf16.msra.mxu1 %v937_v22  ;;  %v856_v29 = vld [vmem:[#allocation8 + $0x80] sm:$0xf]  ;;  %v995_v31 = vld [vmem:[#allocation8 + $0x10c] sm:$0xf0]  ;;  %v914_v35 = vld [vmem:[#allocation8 + $0xf8] sm:$0xf0] }
  0x43   : > { %544 = vmatpush.bf16.msra.mxu2 %v893_v17  ;;  %v921_v33 = vor.u32 %v995_v31, %v920_v27  ;;  %v912_v36 = vld [vmem:[#allocation8 + $0xe8] sm:$0xf]  ;;  %v977_v37 = vld [vmem:[#allocation8 + $0x84] sm:$0xf]  ;;  %v858_v38 = vld [vmem:[#allocation8 + $0x90] sm:$0xf0]  ;;  %v917_v39 = vor.u32 %v990_v34, %v914_v35  ;;  %v857_v43 = vor.u32 %v979_v30, %v856_v29 }
  0x44   : > { %v992_v40 = vld [vmem:[#allocation8 + $0xf4] sm:$0xf0]  ;;  %v986_v42 = vld [vmem:[#allocation8 + $0xcc] sm:$0xf]  ;;  %v898_v44 = vld [vmem:[#allocation8 + $0xd8] sm:$0xf0]  ;;  %v861_v47 = vor.u32 %v977_v37, %v858_v38 }
  0x45   : > { %589 = vmatpush.bf16.msra.mxu3 %v929_v26  ;;  %v913_v41 = vor.u32 %v992_v40, %v912_v36  ;;  %v896_v45 = vld [vmem:[#allocation8 + $0xc8] sm:$0xf]  ;;  %v988_v46 = vld [vmem:[#allocation8 + $0xd4] sm:$0xf0]  ;;  %v840_v48 = vld [vmem:[#allocation8 + $0x60] sm:$0xf]  ;;  %v901_v51 = vor.u32 %v986_v42, %v898_v44 }
  0x46   : > { %519 = vmatpush.bf16.msra.mxu0 %v873_v28  ;;  %537 = vmatpush.bf16.msra.mxu1 %v921_v33  ;;  %v975_v49 = vld [vmem:[#allocation8 + $0x6c] sm:$0xf0]  ;;  %v973_v50 = vld [vmem:[#allocation8 + $0x64] sm:$0xf]  ;;  %v842_v52 = vld [vmem:[#allocation8 + $0x70] sm:$0xf0]  ;;  %v897_v53 = vor.u32 %v988_v46, %v896_v45 }
  0x47   : > { %545 = vmatpush.bf16.msra.mxu2 %v877_v32  ;;  %v982_v54 = vld [vmem:[#allocation8 + $0xac] sm:$0xf]  ;;  %v882_v55 = vld [vmem:[#allocation8 + $0xb8] sm:$0xf0]  ;;  %v880_v56 = vld [vmem:[#allocation8 + $0xa8] sm:$0xf]  ;;  %v841_v58 = vor.u32 %v975_v49, %v840_v48  ;;  %v845_v60 = vor.u32 %v973_v50, %v842_v52 }
  0x48   : > { %v984_v57 = vld [vmem:[#allocation8 + $0xb4] sm:$0xf0]  ;;  %v824_v59 = vld [vmem:[#allocation8 + $0x40] sm:$0xf]  ;;  %v971_v61 = vld [vmem:[#allocation8 + $0x4c] sm:$0xf0]  ;;  %v885_v0 = vor.u32 %v982_v54, %v882_v55 }
  0x49   : > { %595 = vmatpush.bf16.msrb.mxu3 %v917_v39  ;;  %v969_v62 = vld [vmem:[#allocation8 + $0x44] sm:$0xf]  ;;  %v826_v63 = vld [vmem:[#allocation8 + $0x50] sm:$0xf0]  ;;  %v881_v1 = vor.u32 %v984_v57, %v880_v56  ;;  %v978_v2 = vld [vmem:[#allocation8 + $0x8c] sm:$0xf]  ;;  %v825_v8 = vor.u32 %v971_v61, %v824_v59 }
  0x4a   : > { %569 = vmatpush.bf16.msrb.mxu1 %v913_v41  ;;  %520 = vmatpush.bf16.msra.mxu0 %v857_v43  ;;  %v866_v3 = vld [vmem:[#allocation8 + $0x98] sm:$0xf0]  ;;  %v260_v4 = vld [vmem:[%s213_s26] sm:$0xff]  ;;  %v980_v6 = vld [vmem:[#allocation8 + $0x94] sm:$0xf0]  ;;  %vm513_vm0 = vcmask 261120   ;;  %v829_v10 = vor.u32 %v969_v62, %v826_v63 }
  0x4b   : > { %546 = vmatpush.bf16.msra.mxu2 %v861_v47  ;;  %v864_v5 = vld [vmem:[#allocation8 + $0x88] sm:$0xf]  ;;  %v1436_v7 = vpack.c.bf16 %v260_v4, %v260_v4  ;;  %v808_v9 = vld [vmem:[#allocation8 + $0x20] sm:$0xf]  ;;  %v967_v11 = vld [vmem:[#allocation8 + $0x2c] sm:$0xf0]  ;;  %v869_v13 = vor.u32 %v978_v2, %v866_v3 }
  0x4c   : > { %v965_v12 = vld [vmem:[#allocation8 + $0x24] sm:$0xf]  ;;  %v810_v14 = vld [vmem:[#allocation8 + $0x30] sm:$0xf0]  ;;  %v865_v15 = vor.u32 %v980_v6, %v864_v5  ;;  %v974_v16 = vld [vmem:[#allocation8 + $0x6c] sm:$0xf]  ;;  %v809_v20 = vor.u32 %v967_v11, %v808_v9 }
  0x4d   : > { %596 = vmatpush.bf16.msrb.mxu3 %v901_v51  ;;  %v850_v17 = vld [vmem:[#allocation8 + $0x78] sm:$0xf0]  ;;  %950 = vmatmul.msk.bf16.vlgmr.msra.gmra.mxu1 %vm513_vm0, %v1436_v7  ;;  %v848_v18 = vld [vmem:[#allocation8 + $0x68] sm:$0xf]  ;;  %v976_v19 = vld [vmem:[#allocation8 + $0x74] sm:$0xf0]  ;;  %v813_v22 = vor.u32 %v965_v12, %v810_v14 }
  0x4e   : > { %570 = vmatpush.bf16.msrb.mxu1 %v897_v53  ;;  %521 = vmatpush.bf16.msra.mxu0 %v841_v58  ;;  %v792_v21 = vld [vmem:[#allocation8] sm:$0xf]  ;;  %v963_v23 = vld [vmem:[#allocation8 + $0xc] sm:$0xf0]  ;;  %v961_v24 = vld [vmem:[#allocation8 + $0x4] sm:$0xf]  ;;  %v853_v26 = vor.u32 %v974_v16, %v850_v17  ;;  %v849_v27 = vor.u32 %v976_v19, %v848_v18 }
  0x4f   : > { %547 = vmatpush.bf16.msra.mxu2 %v845_v60  ;;  %952 = vmatmul.msk.bf16.vlgmr.msra.gmra.mxu3 %vm513_vm0, %v1436_v7  ;;  %v794_v25 = vld [vmem:[#allocation8 + $0x10] sm:$0xf0]  ;;  %v997_v28 = vld [vmem:[#allocation8 + $0x124] sm:$0xf]  ;;  %v970_v29 = vld [vmem:[#allocation8 + $0x4c] sm:$0xf]  ;;  %v793_v34 = vor.u32 %v963_v23, %v792_v21 }
  0x50   : > { %v834_v30 = vld [vmem:[#allocation8 + $0x58] sm:$0xf0]  ;;  %v938_v31 = vld [vmem:[#allocation8 + $0x130] sm:$0xf0]  ;;  %v832_v32 = vld [vmem:[#allocation8 + $0x48] sm:$0xf]  ;;  %v797_v36 = vor.u32 %v961_v24, %v794_v25 }
  0x51   : > { %597 = vmatpush.bf16.msrb.mxu3 %v885_v0  ;;  %v972_v33 = vld [vmem:[#allocation8 + $0x54] sm:$0xf0]  ;;  %v258_v35 = vld [vmem:[#allocation2] sm:$0xff]  ;;  %v837_v37 = vor.u32 %v970_v29, %v834_v30  ;;  %v998_v38 = vld [vmem:[#allocation8 + $0x12c] sm:$0xf]  ;;  %v941_v40 = vor.u32 %v997_v28, %v938_v31  ;;  %s1297_s20 = smov [#allocation11]  }
  0x52   : > { %571 = vmatpush.bf16.msrb.mxu1 %v881_v1  ;;  %522 = vmatpush.bf16.msra.mxu0 %v825_v8  ;;  %v946_v39 = vld [vmem:[#allocation8 + $0x138] sm:$0xf0]  ;;  %v833_v41 = vor.u32 %v972_v33, %v832_v32  ;;  %v966_v42 = vld [vmem:[#allocation8 + $0x2c] sm:$0xf]  ;;  %v816_v44 = vld [vmem:[#allocation8 + $0x28] sm:$0xf]  ;;  %v302_v45 = vpack.c.bf16 %v258_v35, %v258_v35 }
  0x53   : > { %548 = vmatpush.bf16.msra.mxu2 %v829_v10  ;;  %v818_v43 = vld [vmem:[#allocation8 + $0x38] sm:$0xf0]  ;;  %v968_v46 = vld [vmem:[#allocation8 + $0x34] sm:$0xf0]  ;;  %v993_v47 = vld [vmem:[#allocation8 + $0x104] sm:$0xf]  ;;  %v949_v49 = vor.u32 %v998_v38, %v946_v39 }
  0x54   : > { %v922_v48 = vld [vmem:[#allocation8 + $0x110] sm:$0xf0]  ;;  %v821_v50 = vor.u32 %v966_v42, %v818_v43  ;;  %v994_v51 = vld [vmem:[#allocation8 + $0x10c] sm:$0xf]  ;;  %v930_v52 = vld [vmem:[#allocation8 + $0x118] sm:$0xf0]  ;;  %v817_v53 = vor.u32 %v968_v46, %v816_v44 }
  0x55   : > { %598 = vmatpush.bf16.msrb.mxu3 %v869_v13  ;;  %v925_v54 = vor.u32 %v993_v47, %v922_v48  ;;  %v962_v55 = vld [vmem:[#allocation8 + $0xc] sm:$0xf]  ;;  %v802_v56 = vld [vmem:[#allocation8 + $0x18] sm:$0xf0]  ;;  %v800_v57 = vld [vmem:[#allocation8 + $0x8] sm:$0xf]  ;;  %v933_v59 = vor.u32 %v994_v51, %v930_v52 }
  0x56   : > { %572 = vmatpush.bf16.msrb.mxu1 %v865_v15  ;;  %523 = vmatpush.bf16.msra.mxu0 %v809_v20  ;;  %v964_v58 = vld [vmem:[#allocation8 + $0x14] sm:$0xf0]  ;;  %v805_v60 = vor.u32 %v962_v55, %v802_v56  ;;  %v301_v0 = vld [vmem:[#allocation9] sm:$0xf]  ;;  %s694_s24 = sshll.u32 %s1297_s20, 4  ;;  %s696_s29 = sshll.u32 %s1467_s4, 4  ;;  %s695_s24 = int_to_ptr.vmem [resolvable:$true] %s694_s24  ;;  %s697_s29 = int_to_ptr.hbm [resolvable:$true] %s696_s29 }
  0x57   : > { %549 = vmatpush.bf16.msra.mxu2 %v813_v22  ;;  %v801_v61 = vor.u32 %v964_v58, %v800_v57  ;;  %v305_v2 = vperm.slane %v301_v0, 0  ;;  %v308_v12 = vperm.slane %v301_v0, 3  ;;  %v306_v18 = vperm.slane %v301_v0, 1  ;;  %v259_v57 = vld [vmem:[#allocation2 + $0x8] sm:$0xff]  ;;  %p1040_p1 = scmp.eq.s32.totalorder %s1342_s19, 7 }
  0x59   : > { %599 = vmatpush.bf16.msrb.mxu3 %v853_v26 }
  0x5a   : > { %573 = vmatpush.bf16.msrb.mxu1 %v849_v27  ;;  %524 = vmatpush.bf16.msra.mxu0 %v793_v34  ;;  %v307_v34 = vperm.slane %v301_v0, 2 }
  0x5b   : > { %550 = vmatpush.bf16.msra.mxu2 %v797_v36 }
  0x5d   : > { %600 = vmatpush.bf16.msrb.mxu3 %v837_v37  ;;  %525 = vmatmul.bf16.vlgmr.msra.gmra.mxu0 %v302_v45 }
  0x5e   : > { %574 = vmatpush.bf16.msrb.mxu1 %v833_v41  ;;  %551 = vmatmul.bf16.vlgmr.msra.gmra.mxu2 %v302_v45 }
  0x5f   : > { %562 = vmatpush.bf16.msrb.mxu2 %v941_v40  ;;  %614 = vmatpush.bf16.msrb.mxu0 %v949_v49 }
  0x61   : > { %601 = vmatpush.bf16.msrb.mxu3 %v821_v50 }
  0x62   : > { %575 = vmatpush.bf16.msrb.mxu1 %v817_v53 }
  0x63   : > { %563 = vmatpush.bf16.msrb.mxu2 %v925_v54  ;;  %615 = vmatpush.bf16.msrb.mxu0 %v933_v59 }
  0x65   : > { %602 = vmatpush.bf16.msrb.mxu3 %v805_v60 }
  0x66   : > { %576 = vmatpush.bf16.msrb.mxu1 %v801_v61 }
  0x68   : > { %603 = vmatmul.bf16.vlgmr.msrb.gmra.mxu3 %v302_v45 }
  0x69   : > { %577 = vmatmul.bf16.vlgmr.msrb.gmra.mxu1 %v302_v45 }
  0x6d   : > { %953 = vmatmul.msk.bf16.vlgmr.msrb.gmra.mxu0 %vm513_vm0, %v1436_v7 }
  0x6e   : > { %951 = vmatmul.msk.bf16.vlgmr.msrb.gmra.mxu2 %vm513_vm0, %v1436_v7 }
  0xca   : > { %v539_v62 = vpop.f32.mrf.mxu1 }
  0xd2   : > { %v591_v63 = vpop.f32.mrf.mxu3  ;;  %v541_v1 = vpop.f32.mrf.mxu1 }
  0xda   : > { %v526_v3 = vpop.f32.mrf.mxu0  ;;  %v593_v5 = vpop.f32.mrf.mxu3 }
  0xdb   : > { %v527_v4 = vadd.f32 %v526_v3, %v305_v2 }
  0xdd   : > { %v540_v6 = vadd.f32 %v539_v62, %v527_v4 }
  0xdf   : > { %v954_v8 = vmul.f32 -1.442695, %v540_v6 }
  0xe1   : > { %v552_v9 = vpop.f32.mrf.mxu2  ;;  %1080 = vpow2.f32 %v954_v8 }
  0xe2   : > { %v528_v10 = vpop.f32.mrf.mxu0  ;;  %v553_v22 = vadd.f32 %v552_v9, %v306_v18 }
  0xe6   : > { %v578_v11 = vpop.f32.mrf.mxu1 }
  0xe7   : > { %v1081_v13 = vpop.eup %1080  ;;  %v579_v37 = vadd.f32 %v578_v11, %v307_v34 }
  0xe8   : > { %v624_v17 = vadd.f32 1.0, %v1081_v13 }
  0xe9   : > { %v554_v14 = vpop.f32.mrf.mxu2  ;;  %v592_v41 = vadd.f32 %v591_v63, %v579_v37 }
  0xea   : > { %v617_v16 = vpop.f32.mrf.mxu0  ;;  %1082 = vrcp.f32 %v624_v17  ;;  %vm630_vm1 = vweird.f32 %v624_v17  ;;  %v634_v42 = vand.u32 2147483647, %v624_v17  ;;  %v636_v43 = vand.u32 2147483648, %v624_v17 }
  0xeb   : > { %v604_v15 = vpop.f32.mrf.mxu3 }
  0xec   : > { %v605_v7 = vadd.f32 %v604_v15, %v308_v12  ;;  %vm635_vm4 = vcmp.eq.f32.partialorder %v634_v42, 8.507059e+37  ;;  %v637_v48 = vor.u32 1.1754944e-38, %v636_v43 }
  0xee   : > { %v580_v19 = vpop.f32.mrf.mxu1  ;;  %v618_v20 = vadd.f32 %v617_v16, %v605_v7 }
  0xf0   : > { %v956_v21 = vmul.f32 -1.442695, %v618_v20  ;;  %v1083_v28 = vpop.eup %1082 }
  0xf1   : > { %v565_v23 = vpop.f32.mrf.mxu2  ;;  %v626_v31 = vmul.f32 %v1083_v28, %v624_v17  ;;  %vm631_vm2 = vweird.f32 %v1083_v28 }
  0xf2   : > { %1084 = vpow2.f32 %v956_v21  ;;  %v566_v25 = vadd.f32 %v565_v23, %v553_v22  ;;  %v619_v26 = vpop.f32.mrf.mxu0  ;;  %vm632_vm3 = vmor %vm630_vm1, %vm631_vm2 }
  0xf3   : > { %v606_v24 = vpop.f32.mrf.mxu3  ;;  %v627_v36 = vsub.f32 1.0, %v626_v31 }
  0xf4   : > { %v955_v27 = vmul.f32 -1.442695, %v566_v25 }
  0xf5   : > { %v628_v38 = vmul.f32 %v1083_v28, %v627_v36 }
  0xf6   : > { %1086 = vpow2.f32 %v955_v27 }
  0xf7   : > { %v629_v44 = vadd.f32 %v1083_v28, %v628_v38 }
  0xf8   : > { %v1085_v29 = vpop.eup %1084 }
  0xf9   : > { %v567_v30 = vpop.f32.mrf.mxu2  ;;  %v663_v32 = vadd.f32 1.0, %v1085_v29  ;;  %v633_v50 = vsel %vm632_vm3, %v1083_v28, %v629_v44 }
  0xfa   : > { %v638_v55 = vsel %vm635_vm4, %v637_v48, %v633_v50 }
  0xfb   : > { %1088 = vrcp.f32 %v663_v32  ;;  %vm669_vm9 = vweird.f32 %v663_v32  ;;  %v675_v0 = vand.u32 2147483648, %v663_v32  ;;  %v673_v3 = vand.u32 2147483647, %v663_v32 }
  0xfc   : > { %v1087_v33 = vpop.eup %1086 }
  0xfd   : > { %v643_v35 = vadd.f32 1.0, %v1087_v33  ;;  %v676_v4 = vor.u32 1.1754944e-38, %v675_v0  ;;  %vm674_vm12 = vcmp.eq.f32.partialorder %v673_v3, 8.507059e+37 }
  0xff   : > { %1090 = vrcp.f32 %v643_v35  ;;  %v655_v49 = vand.u32 2147483648, %v643_v35  ;;  %v653_v52 = vand.u32 2147483647, %v643_v35  ;;  %vm649_vm6 = vweird.f32 %v643_v35 }
 0x100   : > { %1092 = vtanh.f32 %v592_v41 }
 0x101   : > { %v1089_v39 = vpop.eup %1088  ;;  %v656_v56 = vor.u32 1.1754944e-38, %v655_v49  ;;  %vm654_vm8 = vcmp.eq.f32.partialorder %v653_v52, 8.507059e+37 }
 0x102   : > { %v665_v46 = vmul.f32 %v1089_v39, %v663_v32  ;;  %vm670_vm10 = vweird.f32 %v1089_v39 }
 0x103   : > { %vm671_vm11 = vmor %vm669_vm9, %vm670_vm10 }
 0x104   : > { %v666_v53 = vsub.f32 1.0, %v665_v46 }
 0x105   : > { %v1091_v40 = vpop.eup %1090 }
 0x106   : > { %v645_v45 = vmul.f32 %v1091_v40, %v643_v35  ;;  %vm650_vm5 = vweird.f32 %v1091_v40  ;;  %v1093_v59 = vpop.eup %1092  ;;  %v667_v61 = vmul.f32 %v1089_v39, %v666_v53 }
 0x107   : > { %vm651_vm7 = vmor %vm649_vm6, %vm650_vm5  ;;  %v680_v62 = vmul.f32 %v1093_v59, %v638_v55 }
 0x108   : > { %v646_v47 = vsub.f32 1.0, %v645_v45  ;;  %v668_v2 = vadd.f32 %v1089_v39, %v667_v61 }
 0x10a   : > { %v647_v51 = vmul.f32 %v1091_v40, %v646_v47  ;;  %v672_v5 = vsel %vm671_vm11, %v1089_v39, %v668_v2 }
 0x10b   : > { %v677_v8 = vsel %vm674_vm12, %v676_v4, %v672_v5 }
 0x10c   : > { %v648_v54 = vadd.f32 %v1091_v40, %v647_v51 }
 0x10e   : > { %v652_v58 = vsel %vm651_vm7, %v1091_v40, %v648_v54 }
 0x10f   : > { %v657_v60 = vsel %vm654_vm8, %v656_v56, %v652_v58 }
 0x110   : > { %v679_v63 = vmul.f32 %v657_v60, %v259_v57 }
 0x112   : > { %v681_v1 = vadd.f32 %v680_v62, %v679_v63 }
 0x114   : > { %1094 = vtanh.f32 %v681_v1  ;;  %685 = vst [vmem:[#allocation2 + $0x8] sm:$0xff] %v681_v1 }
 0x115   : > { %687 = vst [vmem:[#allocation11 + $0x8] sm:$0xff] %v681_v1 }
 0x11a   : > { %v1095_v6 = vpop.eup %1094 }
 0x11b   : > { %v683_v9 = vmul.f32 %v1095_v6, %v677_v8 }
 0x11d   : > { %684 = vst [vmem:[#allocation2] sm:$0xff] %v683_v9 }
 0x11e   : > { %686 = vst [vmem:[#allocation11] sm:$0xff] %v683_v9 }
 0x11f   : > { %1016 = dma.vmem_to_hbm [thread:$0]  (%p1040_p1), %s695_s24, 256, %s697_s29, [#allocation5]  }
 0x120   : > { %1273 = dma.done.wait (%p1040_p1), [#allocation5], 256  }
 0x121   : > { %1275 = vsyncadd (%p1040_p1), [#allocation5], 4294967040 }
 0x122 PF: > { %p17_p4 = scmp.ge.s32.totalorder %s1383_s14, 10   ;;  %s1472_s15 = smov %s1282_s16 }
 0x123   : > { %s1473_s16 = smov %s1286_s17  ;;  %s1474_s17 = smov %s1393_s22 }
 0x124   : > { %s1475_s18 = smov %s1383_s14  ;;  %19 = sbr.rel (!%p17_p4) target bundleno = 6 (0x6), region = 89 }
 0x129   :  { %710 = vsyncpa [#allocation4], 1 }
 0x12a   :  { %712 = vsyncpa [#allocation4 + $0x1], 1 }
 0x12b   :  { %713 = vsyncpa [#allocation7], 1 }
 0x12c   :  { %714 = vsyncpa [#allocation10], 1 }
 0x12d   :  { %715 = vsyncpa [#allocation5], 1 }
 0x12e   :  { %717 = vsyncpa [#allocation5 + $0x1], 1 }

</bundles_post_ra>
